<compile_context>
chip_gen: v6e
topology: v6e:2x2x1
jax: 0.10.0
libtpu: 0.0.40
codegen_flags: <defaults>
</compile_context>

<pallas_src>
import jax
import jax.numpy as jnp
from jax.experimental import pallas as pl
from jax.experimental.pallas import tpu as pltpu


HIDDEN_LAYERS = [64, 128, 64, 32]


def _mlp_kernel(x_ref,
                w1_ref, b1_ref,
                w2_ref, b2_ref,
                w3_ref, b3_ref,
                w4_ref, b4_ref,
                o_ref):
    """Fused 4-layer MLP: (Linear + ReLU) x 4, all tiles resident in VMEM.

    Inputs/weights are bf16 (MXU-native); accumulation, bias-add and ReLU in f32.
    Output block is (bt, 32) f32 -- last dim equals the full array dim, so no padding
    and no post-kernel slice are needed.
    """
    def linear_relu(h_bf16, w_ref, b_ref):
        y = jnp.dot(h_bf16, w_ref[...], preferred_element_type=jnp.float32)
        return jnp.maximum(y + b_ref[...], 0.0)          # f32 bias-add + ReLU (VPU)

    h = x_ref[...]                                        # bf16 feed straight to MXU
    h = linear_relu(h, w1_ref, b1_ref).astype(jnp.bfloat16)
    h = linear_relu(h, w2_ref, b2_ref).astype(jnp.bfloat16)
    h = linear_relu(h, w3_ref, b3_ref).astype(jnp.bfloat16)
    o_ref[...] = linear_relu(h, w4_ref, b4_ref)           # (bt, 32) f32


def _choose_batch_tile(B, requested=None):
    """Adaptive tile: ~B//8 steps, clamped to [256, 1024], multiple of 16 (bf16 rows)."""
    bt = int(requested) if requested is not None else max(256, min(1024, B // 8))
    bt = min(bt, B)
    if bt != B:                       # full-array block is always legal; else align
        bt -= bt % 16
        if bt <= 0:
            bt = B
    return bt


def lazy_mlp2_forward(x, params, *, batch_tile=None):
    """Run LazyMLP2 forward via a single pallas_call.

    x: (B, F) float32 (cast to bf16 for streaming)
    params: list of 4 (w, b) with w (in, out) f32, b (out,) or (1, out) f32
    """
    B, F = x.shape
    out_dim = params[-1][0].shape[1]

    bt = _choose_batch_tile(B, batch_tile)
    n_tiles = pl.cdiv(B, bt)

    # dtype prep done once in the wrapper, outside the grid loop.
    x_bf = x.astype(jnp.bfloat16)
    prepped = [(w.astype(jnp.bfloat16), b.astype(jnp.float32).reshape(1, -1))
               for (w, b) in params]

    # x is tiled over batch; every weight/bias is a full-array block with a constant
    # index map (DMA'd once, resident in VMEM across all grid steps).
    in_specs = [pl.BlockSpec((bt, F), lambda i: (i, 0))]
    flat_params = []
    for (w, b) in prepped:
        in_specs.append(pl.BlockSpec(w.shape, lambda i: (0, 0)))
        in_specs.append(pl.BlockSpec(b.shape, lambda i: (0, 0)))
        flat_params.extend([w, b])

    out_spec = pl.BlockSpec((bt, out_dim), lambda i: (i, 0))

    macs = sum(int(w.shape[0]) * int(w.shape[1]) for (w, _) in prepped)
    cost = pl.CostEstimate(
        flops=2 * B * macs,
        transcendentals=0,
        bytes_accessed=(B * F * 2                          # bf16 x in
                        + B * out_dim * 4                  # f32 out (unpadded)
                        + sum(int(w.size) * 2 + int(b.size) * 4
                              for (w, b) in prepped)),
    )

    return pl.pallas_call(
        _mlp_kernel,
        out_shape=jax.ShapeDtypeStruct((B, out_dim), jnp.float32),
        grid_spec=pltpu.PrefetchScalarGridSpec(
            num_scalar_prefetch=0,
            grid=(n_tiles,),
            in_specs=in_specs,
            out_specs=out_spec,
        ),
        compiler_params=pltpu.CompilerParams(
            dimension_semantics=("parallel",),             # shards tiles across TCs (v7x)
            vmem_limit_bytes=16 * 1024 * 1024,
        ),
        cost_estimate=cost,
    )(x_bf, *flat_params)


def init_params(key, in_features, hidden_layers=HIDDEN_LAYERS):
    """Deterministic init mimicking nn.Linear default U(-1/sqrt(fan_in), 1/sqrt(fan_in))."""
    params = []
    dims = [in_features] + list(hidden_layers)
    for d_in, d_out in zip(dims[:-1], dims[1:]):
        key, kw, kb = jax.random.split(key, 3)
        bound = 1.0 / jnp.sqrt(jnp.float32(d_in))
        w = jax.random.uniform(kw, (d_in, d_out), jnp.float32, -bound, bound)
        b = jax.random.uniform(kb, (1, d_out), jnp.float32, -bound, bound)
        params.append((w, b))
    return params


def reference_forward(x, params):
    """Pure-JAX reference matching the kernel's numerics (bf16 feeds, f32 accumulate)."""
    h = x.astype(jnp.bfloat16).astype(jnp.float32)
    for li, (w, b) in enumerate(params):
        w32 = w.astype(jnp.bfloat16).astype(jnp.float32)
        y = jnp.dot(h, w32, precision=jax.lax.Precision.HIGHEST) + b.reshape(1, -1)
        y = jnp.maximum(y, 0.0)
        h = y.astype(jnp.bfloat16).astype(jnp.float32) if li < len(params) - 1 else y
    return h


if __name__ == "__main__":
    key = jax.random.PRNGKey(0)
    kx, kp, kx2 = jax.random.split(key, 3)

    # Feature dims come from the module (LazyLinear infers F from x); batch kept small
    # but big enough that the adaptive tile (bt=256) yields a multi-step grid (4 steps).
    B, F = 1024, 32
    x = jax.random.normal(kx, (B, F), jnp.float32)
    params = init_params(kp, F)

    out = lazy_mlp2_forward(x, params)
    out = jax.block_until_ready(out)
    ref = reference_forward(x, params)
    assert out.shape == (B, HIDDEN_LAYERS[-1])
    assert jnp.allclose(out, ref, atol=2e-3, rtol=2e-3), "mismatch vs pure-JAX reference"

    # Ragged-tile check: B not a multiple of bt (Pallas masks the out-of-range rows of
    # the last block on writeback; rows are independent, so this is safe).
    B2 = 328                                               # bt=256 -> grid=(2,), last tile ragged
    x2 = jax.random.normal(kx2, (B2, F), jnp.float32)
    out2 = jax.block_until_ready(lazy_mlp2_forward(x2, params))
    ref2 = reference_forward(x2, params)
    assert out2.shape == (B2, HIDDEN_LAYERS[-1])
    assert jnp.allclose(out2, ref2, atol=2e-3, rtol=2e-3), "ragged-tile mismatch vs reference"

    print("KERNEL_OK")
</pallas_src>

<mosaic_0001>
module attributes {stable_mosaic.version = 11 : i64} {
  func.func @_mlp_kernel(%arg0: i32, %arg1: memref<256x32xbf16, #tpu.memory_space<vmem>>, %arg2: memref<32x64xbf16, #tpu.memory_space<vmem>>, %arg3: memref<1x64xf32, #tpu.memory_space<vmem>>, %arg4: memref<64x128xbf16, #tpu.memory_space<vmem>>, %arg5: memref<1x128xf32, #tpu.memory_space<vmem>>, %arg6: memref<128x64xbf16, #tpu.memory_space<vmem>>, %arg7: memref<1x64xf32, #tpu.memory_space<vmem>>, %arg8: memref<64x32xbf16, #tpu.memory_space<vmem>>, %arg9: memref<1x32xf32, #tpu.memory_space<vmem>>, %arg10: memref<256x32xf32, #tpu.memory_space<vmem>>) attributes {dimension_semantics = [#tpu.dimension_semantics<parallel>], iteration_bounds = array<i64: 4>, scalar_prefetch = 0 : i64, scratch_operands = 0 : i64, tpu.core_type = #tpu.core_type<tc>, window_params = [{transform_indices = @transform_0, window_bounds = array<i64: 256, 32>}, {pipeline_mode = #tpu.pipeline_mode<synchronous>, transform_indices = @transform_1, window_bounds = array<i64: 32, 64>}, {pipeline_mode = #tpu.pipeline_mode<synchronous>, transform_indices = @transform_2, window_bounds = array<i64: 1, 64>}, {pipeline_mode = #tpu.pipeline_mode<synchronous>, transform_indices = @transform_3, window_bounds = array<i64: 64, 128>}, {pipeline_mode = #tpu.pipeline_mode<synchronous>, transform_indices = @transform_4, window_bounds = array<i64: 1, 128>}, {pipeline_mode = #tpu.pipeline_mode<synchronous>, transform_indices = @transform_5, window_bounds = array<i64: 128, 64>}, {pipeline_mode = #tpu.pipeline_mode<synchronous>, transform_indices = @transform_6, window_bounds = array<i64: 1, 64>}, {pipeline_mode = #tpu.pipeline_mode<synchronous>, transform_indices = @transform_7, window_bounds = array<i64: 64, 32>}, {pipeline_mode = #tpu.pipeline_mode<synchronous>, transform_indices = @transform_8, window_bounds = array<i64: 1, 32>}, {transform_indices = @transform_9, window_bounds = array<i64: 256, 32>}]} {
    %c0 = arith.constant 0 : index
    %c0_0 = arith.constant 0 : index
    %0 = vector.load %arg1[%c0, %c0_0] : memref<256x32xbf16, #tpu.memory_space<vmem>>, vector<256x32xbf16>
    %c0_1 = arith.constant 0 : index
    %c0_2 = arith.constant 0 : index
    %1 = vector.load %arg2[%c0_1, %c0_2] : memref<32x64xbf16, #tpu.memory_space<vmem>>, vector<32x64xbf16>
    %cst = arith.constant dense<0.000000e+00> : vector<256x64xf32>
    %2 = tpu.matmul %0, %1, %cst {dimension_numbers = #tpu.dot_dimension_numbers<[1], [0], [0], [1], [0, 0, 1, 1], [], []>} : vector<256x32xbf16>, vector<32x64xbf16>, vector<256x64xf32> -> vector<256x64xf32>
    %c0_3 = arith.constant 0 : index
    %c0_4 = arith.constant 0 : index
    %3 = vector.load %arg3[%c0_3, %c0_4] : memref<1x64xf32, #tpu.memory_space<vmem>>, vector<1x64xf32>
    %4 = vector.broadcast %3 : vector<1x64xf32> to vector<256x64xf32>
    %5 = arith.addf %2, %4 : vector<256x64xf32>
    %cst_5 = arith.constant 0.000000e+00 : f32
    %6 = vector.broadcast %cst_5 : f32 to vector<256x64xf32>
    %7 = arith.maximumf %5, %6 : vector<256x64xf32>
    %8 = arith.truncf %7 : vector<256x64xf32> to vector<256x64xbf16>
    %c0_6 = arith.constant 0 : index
    %c0_7 = arith.constant 0 : index
    %9 = vector.load %arg4[%c0_6, %c0_7] : memref<64x128xbf16, #tpu.memory_space<vmem>>, vector<64x128xbf16>
    %cst_8 = arith.constant dense<0.000000e+00> : vector<256x128xf32>
    %10 = tpu.matmul %8, %9, %cst_8 {dimension_numbers = #tpu.dot_dimension_numbers<[1], [0], [0], [1], [0, 0, 1, 1], [], []>} : vector<256x64xbf16>, vector<64x128xbf16>, vector<256x128xf32> -> vector<256x128xf32>
    %c0_9 = arith.constant 0 : index
    %c0_10 = arith.constant 0 : index
    %11 = vector.load %arg5[%c0_9, %c0_10] : memref<1x128xf32, #tpu.memory_space<vmem>>, vector<1x128xf32>
    %12 = vector.broadcast %11 : vector<1x128xf32> to vector<256x128xf32>
    %13 = arith.addf %10, %12 : vector<256x128xf32>
    %cst_11 = arith.constant 0.000000e+00 : f32
    %14 = vector.broadcast %cst_11 : f32 to vector<256x128xf32>
    %15 = arith.maximumf %13, %14 : vector<256x128xf32>
    %16 = arith.truncf %15 : vector<256x128xf32> to vector<256x128xbf16>
    %c0_12 = arith.constant 0 : index
    %c0_13 = arith.constant 0 : index
    %17 = vector.load %arg6[%c0_12, %c0_13] : memref<128x64xbf16, #tpu.memory_space<vmem>>, vector<128x64xbf16>
    %cst_14 = arith.constant dense<0.000000e+00> : vector<256x64xf32>
    %18 = tpu.matmul %16, %17, %cst_14 {dimension_numbers = #tpu.dot_dimension_numbers<[1], [0], [0], [1], [0, 0, 1, 1], [], []>} : vector<256x128xbf16>, vector<128x64xbf16>, vector<256x64xf32> -> vector<256x64xf32>
    %c0_15 = arith.constant 0 : index
    %c0_16 = arith.constant 0 : index
    %19 = vector.load %arg7[%c0_15, %c0_16] : memref<1x64xf32, #tpu.memory_space<vmem>>, vector<1x64xf32>
    %20 = vector.broadcast %19 : vector<1x64xf32> to vector<256x64xf32>
    %21 = arith.addf %18, %20 : vector<256x64xf32>
    %cst_17 = arith.constant 0.000000e+00 : f32
    %22 = vector.broadcast %cst_17 : f32 to vector<256x64xf32>
    %23 = arith.maximumf %21, %22 : vector<256x64xf32>
    %24 = arith.truncf %23 : vector<256x64xf32> to vector<256x64xbf16>
    %c0_18 = arith.constant 0 : index
    %c0_19 = arith.constant 0 : index
    %25 = vector.load %arg8[%c0_18, %c0_19] : memref<64x32xbf16, #tpu.memory_space<vmem>>, vector<64x32xbf16>
    %cst_20 = arith.constant dense<0.000000e+00> : vector<256x32xf32>
    %26 = tpu.matmul %24, %25, %cst_20 {dimension_numbers = #tpu.dot_dimension_numbers<[1], [0], [0], [1], [0, 0, 1, 1], [], []>} : vector<256x64xbf16>, vector<64x32xbf16>, vector<256x32xf32> -> vector<256x32xf32>
    %c0_21 = arith.constant 0 : index
    %c0_22 = arith.constant 0 : index
    %27 = vector.load %arg9[%c0_21, %c0_22] : memref<1x32xf32, #tpu.memory_space<vmem>>, vector<1x32xf32>
    %28 = vector.broadcast %27 : vector<1x32xf32> to vector<256x32xf32>
    %29 = arith.addf %26, %28 : vector<256x32xf32>
    %cst_23 = arith.constant 0.000000e+00 : f32
    %30 = vector.broadcast %cst_23 : f32 to vector<256x32xf32>
    %31 = arith.maximumf %29, %30 : vector<256x32xf32>
    %c0_24 = arith.constant 0 : index
    %c0_25 = arith.constant 0 : index
    %32 = vector.load %arg10[%c0_24, %c0_25] : memref<256x32xf32, #tpu.memory_space<vmem>>, vector<256x32xf32>
    tpu.vector_store %arg10[%c0_24, %c0_25], %31 {strides = array<i32>} : memref<256x32xf32, #tpu.memory_space<vmem>>, vector<256x32xf32>,
    return
  }
  func.func @transform_0(%arg0: i32) -> (i32, i32) {
    %c0_i32 = arith.constant 0 : i32
    %c0_i32_0 = arith.constant 0 : i32
    return %arg0, %c0_i32 : i32, i32
  }
  func.func @transform_1(%arg0: i32) -> (i32, i32) {
    %c0_i32 = arith.constant 0 : i32
    %c0_i32_0 = arith.constant 0 : i32
    %c0_i32_1 = arith.constant 0 : i32
    return %c0_i32, %c0_i32_0 : i32, i32
  }
  func.func @transform_2(%arg0: i32) -> (i32, i32) {
    %c0_i32 = arith.constant 0 : i32
    %c0_i32_0 = arith.constant 0 : i32
    %c0_i32_1 = arith.constant 0 : i32
    return %c0_i32, %c0_i32_0 : i32, i32
  }
  func.func @transform_3(%arg0: i32) -> (i32, i32) {
    %c0_i32 = arith.constant 0 : i32
    %c0_i32_0 = arith.constant 0 : i32
    %c0_i32_1 = arith.constant 0 : i32
    return %c0_i32, %c0_i32_0 : i32, i32
  }
  func.func @transform_4(%arg0: i32) -> (i32, i32) {
    %c0_i32 = arith.constant 0 : i32
    %c0_i32_0 = arith.constant 0 : i32
    %c0_i32_1 = arith.constant 0 : i32
    return %c0_i32, %c0_i32_0 : i32, i32
  }
  func.func @transform_5(%arg0: i32) -> (i32, i32) {
    %c0_i32 = arith.constant 0 : i32
    %c0_i32_0 = arith.constant 0 : i32
    %c0_i32_1 = arith.constant 0 : i32
    return %c0_i32, %c0_i32_0 : i32, i32
  }
  func.func @transform_6(%arg0: i32) -> (i32, i32) {
    %c0_i32 = arith.constant 0 : i32
    %c0_i32_0 = arith.constant 0 : i32
    %c0_i32_1 = arith.constant 0 : i32
    return %c0_i32, %c0_i32_0 : i32, i32
  }
  func.func @transform_7(%arg0: i32) -> (i32, i32) {
    %c0_i32 = arith.constant 0 : i32
    %c0_i32_0 = arith.constant 0 : i32
    %c0_i32_1 = arith.constant 0 : i32
    return %c0_i32, %c0_i32_0 : i32, i32
  }
  func.func @transform_8(%arg0: i32) -> (i32, i32) {
    %c0_i32 = arith.constant 0 : i32
    %c0_i32_0 = arith.constant 0 : i32
    %c0_i32_1 = arith.constant 0 : i32
    return %c0_i32, %c0_i32_0 : i32, i32
  }
  func.func @transform_9(%arg0: i32) -> (i32, i32) {
    %c0_i32 = arith.constant 0 : i32
    %c0_i32_0 = arith.constant 0 : i32
    return %arg0, %c0_i32 : i32, i32
  }
}

</mosaic_0001>

<bundles_post_ra>
// kernel: tpu_custom_call.1
= control target key start
LH: loop header
LB: loop body
LE: loop exit
PB: predicated region body
PF: predicated region fallthrough
CT: control target
= control target key end

     0   :  { %s2118_s30 = smov 0   ;;  %s2473_s0 = inlined_call_operand.vmem [shape: bf16[1024,32], index: 0, kind: input, shape index: {}]   ;;  %s2474_s1 = inlined_call_operand.vmem [shape: bf16[32,64], index: 1, kind: input, shape index: {}]   ;;  %s2475_s2 = inlined_call_operand.vmem [shape: f32[1,64], index: 2, kind: input, shape index: {}]   ;;  %s2476_s3 = inlined_call_operand.vmem [shape: bf16[64,128], index: 3, kind: input, shape index: {}]   ;;  %s2477_s4 = inlined_call_operand.vmem [shape: f32[1,128], index: 4, kind: input, shape index: {}]   ;;  %s2478_s5 = inlined_call_operand.vmem [shape: bf16[128,64], index: 5, kind: input, shape index: {}]   ;;  %s2479_s6 = inlined_call_operand.vmem [shape: f32[1,64], index: 6, kind: input, shape index: {}]   ;;  %s2480_s7 = inlined_call_operand.vmem [shape: bf16[64,32], index: 7, kind: input, shape index: {}]   ;;  %s2481_s8 = inlined_call_operand.vmem [shape: f32[1,32], index: 8, kind: input, shape index: {}]   ;;  %s2482_s9 = inlined_call_operand.vmem [shape: f32[1024,32], index: 9, kind: output, shape index: {}]  }
   0x1 LB: > { %s1675_s10 = sadd.s32 4294967295, %s2066_s30   ;;  %p1679_p0 = scmp.ge.s32.totalorder %s2066_s30, 1  ;;  %s2066_s30 = sphi %s2118_s30, %s19_s30  }
   0x2   : > { %p288_p1 = scmp.lt.s32.totalorder %s2066_s30, 5 }
   0x4   : > { %p289_p2 = pnand %p1679_p0, %p288_p1 }
   0x5   : > { %s1680_s13 = sshll.u32 (!%p289_p2), %s1675_s10, 5 }
   0x6   : > { %292 = sbr.rel (%p289_p2) target bundleno = 898 (0x382), region = 56  ;;  %p325_p3 = scmp.lt.s32.totalorder (!%p289_p2), %s1680_s13, 127 }
   0xb   : > { %v2026_v0 = vld [vmem:[%s2474_s1 + $0x8] sm:$0xff]   ;;  %v2027_v1 = vld [vmem:[%s2474_s1] sm:$0xff]   ;;  %v2044_v2 = vld [vmem:[%s2476_s3 + $0x18] sm:$0xff]   ;;  %s2484_s13 = smov (!%p325_p3, %s1680_s13), 127  ;;  %vm472_vm0 = vcmask 261120   ;;  %vm769_vm1 = vcmask 523264  }
   0xc   : > { %1854 = vmatprep.subr.bf16.mxu0 %v2026_v0  ;;  %1890 = vmatprep.subr.bf16.mxu1 %v2044_v2  ;;  %s1681_s18 = sshll.u32 %s2484_s13, 2  ;;  %v2045_v19 = vld [vmem:[%s2476_s3 + $0x10] sm:$0xff]   ;;  %v2046_v20 = vld [vmem:[%s2476_s3 + $0x8] sm:$0xff]   ;;  %v2047_v21 = vld [vmem:[%s2476_s3] sm:$0xff]   ;;  %s1683_s22 = sshll.u32 %s2484_s13, 3 }
   0xd   : > { %1855 = vmatpush3.bf16.msra.mxu0 %v2026_v0  ;;  %1891 = vmatpush3.bf16.msra.mxu1 %v2044_v2  ;;  %s2141_s21 = scalar_lea.vmem %s2473_s0, %s1681_s18  ;;  %v2048_v22 = vld [vmem:[%s2478_s5 + $0x38] sm:$0xff]   ;;  %v2049_v23 = vld [vmem:[%s2478_s5 + $0x30] sm:$0xff]   ;;  %v2050_v24 = vld [vmem:[%s2478_s5 + $0x28] sm:$0xff]   ;;  %s2373_s25 = scalar_lea.vmem %s2482_s9, %s1683_s22 }
   0xe   : > { %1856 = vmatprep.subr.bf16.mxu0 %v2027_v1  ;;  %v2028_v3 = vld [vmem:[%s2141_s21] sm:$0xff]   ;;  %v2029_v4 = vld [vmem:[%s2141_s21 + $0x8] sm:$0xff]   ;;  %v2030_v5 = vld [vmem:[%s2141_s21 + $0x10] sm:$0xff]   ;;  %1892 = vmatprep.subr.bf16.mxu1 %v2045_v19 }
   0xf   : > { %1858 = vmatprep.mubr.msk.bf16.mxu0 %vm472_vm0, %v2028_v3  ;;  %v2031_v6 = vld [vmem:[%s2141_s21 + $0x18] sm:$0xff]   ;;  %v2032_v7 = vld [vmem:[%s2141_s21 + $0x20] sm:$0xff]   ;;  %v2033_v8 = vld [vmem:[%s2141_s21 + $0x28] sm:$0xff]  }
  0x10   : > { %v2034_v9 = vld [vmem:[%s2141_s21 + $0x30] sm:$0xff]   ;;  %v2035_v10 = vld [vmem:[%s2141_s21 + $0x38] sm:$0xff]   ;;  %v2036_v11 = vld [vmem:[%s2141_s21 + $0x40] sm:$0xff]  }
  0x11   : > { %1857 = vmatpush3.bf16.msra.mxu0 %v2027_v1  ;;  %v2037_v12 = vld [vmem:[%s2141_s21 + $0x48] sm:$0xff]   ;;  %v2038_v13 = vld [vmem:[%s2141_s21 + $0x50] sm:$0xff]   ;;  %v2039_v14 = vld [vmem:[%s2141_s21 + $0x58] sm:$0xff]   ;;  %1893 = vmatpush3.bf16.msra.mxu1 %v2045_v19 }
  0x12   : > { %v2040_v15 = vld [vmem:[%s2141_s21 + $0x60] sm:$0xff]   ;;  %v2041_v16 = vld [vmem:[%s2141_s21 + $0x68] sm:$0xff]   ;;  %v2042_v17 = vld [vmem:[%s2141_s21 + $0x70] sm:$0xff]   ;;  %1894 = vmatprep.subr.bf16.mxu1 %v2046_v20  ;;  %1930 = vmatprep.subr.bf16.mxu0 %v2048_v22 }
  0x13   : > { %v2043_v18 = vld [vmem:[%s2141_s21 + $0x78] sm:$0xff]   ;;  %v2051_v25 = vld [vmem:[%s2478_s5 + $0x20] sm:$0xff]   ;;  %v2053_v27 = vld [vmem:[%s2478_s5 + $0x10] sm:$0xff]  }
  0x14   : > { %1859 = vmatmul.mubr.msk.bf16.vlgmr.msra.gmra.mxu0 %vm472_vm0, %v2029_v4  ;;  %v2052_v26 = vld [vmem:[%s2478_s5 + $0x18] sm:$0xff]   ;;  %v2054_v28 = vld [vmem:[%s2478_s5 + $0x8] sm:$0xff]   ;;  %v2208_v31 = vld [vmem:[%s2475_s2] ss:$0 sm:$0xff] }
  0x15   : > { %1862 = vmatprep.mubr.msk.bf16.mxu0 %vm472_vm0, %v2030_v5  ;;  %1895 = vmatpush3.bf16.msra.mxu1 %v2046_v20 }
  0x16   : > { %1896 = vmatprep.subr.bf16.mxu1 %v2047_v21  ;;  %1931 = vmatpush3.bf16.msra.mxu0 %v2048_v22 }
  0x17   : > { %1932 = vmatprep.subr.bf16.mxu0 %v2049_v23 }
  0x19   : > { %1897 = vmatpush3.bf16.msra.mxu1 %v2047_v21 }
  0x1a   : > { %1933 = vmatpush3.bf16.msra.mxu0 %v2049_v23 }
  0x1b   : > { %1934 = vmatprep.subr.bf16.mxu0 %v2050_v24 }
  0x1c   : > { %1863 = vmatmul.mubr.msk.bf16.gmra.mxu0 %vm472_vm0, %v2031_v6 }
  0x1d   : > { %1866 = vmatprep.mubr.msk.bf16.mxu0 %vm472_vm0, %v2032_v7 }
  0x1e   : > { %1935 = vmatpush3.bf16.msra.mxu0 %v2050_v24 }
  0x1f   : > { %1936 = vmatprep.subr.bf16.mxu0 %v2051_v25 }
  0x22   : > { %1937 = vmatpush3.bf16.msra.mxu0 %v2051_v25 }
  0x23   : > { %1938 = vmatprep.subr.bf16.mxu0 %v2052_v26 }
  0x24   : > { %1867 = vmatmul.mubr.msk.bf16.gmra.mxu0 %vm472_vm0, %v2033_v8 }
  0x25   : > { %1870 = vmatprep.mubr.msk.bf16.mxu0 %vm472_vm0, %v2034_v9 }
  0x26   : > { %1939 = vmatpush3.bf16.msra.mxu0 %v2052_v26 }
  0x27   : > { %1940 = vmatprep.subr.bf16.mxu0 %v2053_v27 }
  0x2a   : > { %1941 = vmatpush3.bf16.msra.mxu0 %v2053_v27 }
  0x2b   : > { %1942 = vmatprep.subr.bf16.mxu0 %v2054_v28 }
  0x2c   : > { %1871 = vmatmul.mubr.msk.bf16.gmra.mxu0 %vm472_vm0, %v2035_v10 }
  0x2d   : > { %1874 = vmatprep.mubr.msk.bf16.mxu0 %vm472_vm0, %v2036_v11 }
  0x2e   : > { %1943 = vmatpush3.bf16.msra.mxu0 %v2054_v28 }
  0x34   : > { %1875 = vmatmul.mubr.msk.bf16.gmra.mxu0 %vm472_vm0, %v2037_v12 }
  0x35   : > { %1878 = vmatprep.mubr.msk.bf16.mxu0 %vm472_vm0, %v2038_v13 }
  0x3c   : > { %1879 = vmatmul.mubr.msk.bf16.gmra.mxu0 %vm472_vm0, %v2039_v14 }
  0x3d   : > { %1882 = vmatprep.mubr.msk.bf16.mxu0 %vm472_vm0, %v2040_v15 }
  0x44   : > { %1883 = vmatmul.mubr.msk.bf16.gmra.mxu0 %vm472_vm0, %v2041_v16 }
  0x45   : > { %1886 = vmatprep.mubr.msk.bf16.mxu0 %vm472_vm0, %v2042_v17 }
  0x4c   : > { %1887 = vmatmul.mubr.msk.bf16.gmra.mxu0 %vm472_vm0, %v2043_v18 }
  0xd4   : > { %v1860_v29 = vpop.f32.mrf.mxu0 }
  0xd5   : > { %v564_v35 = vadd.f32 %v1860_v29, %v2208_v31 }
  0xd6   : > { %v555_v30 = vpop.f32.mrf.mxu0 }
  0xd7   : > { %v556_v33 = vadd.f32 %v2208_v31, %v555_v30  ;;  %v684_v42 = vmax.f32 %v564_v35, 0.0 }
  0xd8   : > { %v1861_v32 = vpop.f32.mrf.mxu0 }
  0xd9   : > { %v567_v34 = vadd.f32 %v1861_v32, %v2208_v31  ;;  %v682_v40 = vmax.f32 %v556_v33, 0.0 }
  0xda   : > { %v558_v36 = vpop.f32.mrf.mxu0 }
  0xdb   : > { %v559_v37 = vadd.f32 %v2208_v31, %v558_v36  ;;  %v685_v38 = vmax.f32 %v567_v34, 0.0 }
  0xdc   : > { %v1864_v39 = vpop.f32.mrf.mxu0 }
  0xdd   : > { %v683_v41 = vmax.f32 %v559_v37, 0.0  ;;  %v715_v45 = vpack.c.bf16 %v685_v38, %v684_v42  ;;  %v580_v49 = vadd.f32 %v1864_v39, %v2208_v31 }
  0xde   : > { %v571_v43 = vpop.f32.mrf.mxu0 }
  0xdf   : > { %v714_v44 = vpack.c.bf16 %v683_v41, %v682_v40  ;;  %v572_v47 = vadd.f32 %v2208_v31, %v571_v43  ;;  %v688_v56 = vmax.f32 %v580_v49, 0.0 }
  0xe0   : > { %v1865_v46 = vpop.f32.mrf.mxu0 }
  0xe1   : > { %v583_v48 = vadd.f32 %v1865_v46, %v2208_v31  ;;  %1898 = vmatprep.mubr.msk.bf16.mxu1 %vm769_vm1, %v714_v44  ;;  %v686_v54 = vmax.f32 %v572_v47, 0.0 }
  0xe2   : > { %v574_v50 = vpop.f32.mrf.mxu0  ;;  %1899 = vmatmul.mubr.msk.bf16.vlgmr.msra.gmra.mxu1 %vm769_vm1, %v715_v45 }
  0xe3   : > { %v575_v51 = vadd.f32 %v2208_v31, %v574_v50  ;;  %v689_v52 = vmax.f32 %v583_v48, 0.0 }
  0xe4   : > { %v1868_v53 = vpop.f32.mrf.mxu0 }
  0xe5   : > { %v687_v55 = vmax.f32 %v575_v51, 0.0  ;;  %v717_v59 = vpack.c.bf16 %v689_v52, %v688_v56  ;;  %v596_v63 = vadd.f32 %v1868_v53, %v2208_v31 }
  0xe6   : > { %v587_v57 = vpop.f32.mrf.mxu0 }
  0xe7   : > { %v716_v58 = vpack.c.bf16 %v687_v55, %v686_v54  ;;  %v588_v61 = vadd.f32 %v2208_v31, %v587_v57  ;;  %v692_v6 = vmax.f32 %v596_v63, 0.0 }
  0xe8   : > { %v1869_v60 = vpop.f32.mrf.mxu0 }
  0xe9   : > { %v599_v62 = vadd.f32 %v1869_v60, %v2208_v31  ;;  %1902 = vmatprep.mubr.msk.bf16.mxu1 %vm769_vm1, %v716_v58  ;;  %v690_v4 = vmax.f32 %v588_v61, 0.0 }
  0xea   : > { %v590_v0 = vpop.f32.mrf.mxu0  ;;  %1903 = vmatmul.mubr.msk.bf16.gmra.mxu1 %vm769_vm1, %v717_v59 }
  0xeb   : > { %v591_v1 = vadd.f32 %v2208_v31, %v590_v0  ;;  %v693_v2 = vmax.f32 %v599_v62, 0.0 }
  0xec   : > { %v1872_v3 = vpop.f32.mrf.mxu0 }
  0xed   : > { %v691_v5 = vmax.f32 %v591_v1, 0.0  ;;  %v719_v9 = vpack.c.bf16 %v693_v2, %v692_v6  ;;  %v612_v13 = vadd.f32 %v1872_v3, %v2208_v31 }
  0xee   : > { %v603_v7 = vpop.f32.mrf.mxu0 }
  0xef   : > { %v718_v8 = vpack.c.bf16 %v691_v5, %v690_v4  ;;  %v604_v11 = vadd.f32 %v2208_v31, %v603_v7  ;;  %v696_v20 = vmax.f32 %v612_v13, 0.0 }
  0xf0   : > { %v1873_v10 = vpop.f32.mrf.mxu0 }
  0xf1   : > { %v615_v12 = vadd.f32 %v1873_v10, %v2208_v31  ;;  %1906 = vmatprep.mubr.msk.bf16.mxu1 %vm769_vm1, %v718_v8  ;;  %v694_v18 = vmax.f32 %v604_v11, 0.0 }
  0xf2   : > { %v606_v14 = vpop.f32.mrf.mxu0  ;;  %1907 = vmatmul.mubr.msk.bf16.gmra.mxu1 %vm769_vm1, %v719_v9 }
  0xf3   : > { %v607_v15 = vadd.f32 %v2208_v31, %v606_v14  ;;  %v697_v16 = vmax.f32 %v615_v12, 0.0 }
  0xf4   : > { %v1876_v17 = vpop.f32.mrf.mxu0 }
  0xf5   : > { %v695_v19 = vmax.f32 %v607_v15, 0.0  ;;  %v721_v23 = vpack.c.bf16 %v697_v16, %v696_v20  ;;  %v628_v27 = vadd.f32 %v1876_v17, %v2208_v31  ;;  %v2055_v15 = vld [vmem:[%s2478_s5] sm:$0xff]   ;;  %v2057_v16 = vld [vmem:[%s2480_s7 + $0x10] sm:$0xff]   ;;  %v2058_v17 = vld [vmem:[%s2480_s7 + $0x8] sm:$0xff]  }
  0xf6   : > { %v619_v21 = vpop.f32.mrf.mxu0  ;;  %1944 = vmatprep.subr.bf16.mxu0 %v2055_v15 }
  0xf7   : > { %v720_v22 = vpack.c.bf16 %v695_v19, %v694_v18  ;;  %v620_v25 = vadd.f32 %v2208_v31, %v619_v21  ;;  %v700_v35 = vmax.f32 %v628_v27, 0.0  ;;  %1945 = vmatpush3.bf16.msra.mxu0 %v2055_v15  ;;  %v2059_v18 = vld [vmem:[%s2480_s7] sm:$0xff]  }
  0xf8   : > { %v1877_v24 = vpop.f32.mrf.mxu0  ;;  %v2276_v21 = vld [vmem:[%s2477_s4] ss:$0 sm:$0xff] }
  0xf9   : > { %v631_v26 = vadd.f32 %v1877_v24, %v2208_v31  ;;  %1910 = vmatprep.mubr.msk.bf16.mxu1 %vm769_vm1, %v720_v22  ;;  %v698_v33 = vmax.f32 %v620_v25, 0.0 }
  0xfa   : > { %v622_v28 = vpop.f32.mrf.mxu0  ;;  %1911 = vmatmul.mubr.msk.bf16.gmra.mxu1 %vm769_vm1, %v721_v23 }
  0xfb   : > { %v623_v29 = vadd.f32 %v2208_v31, %v622_v28  ;;  %v701_v30 = vmax.f32 %v631_v26, 0.0 }
  0xfc   : > { %v1880_v32 = vpop.f32.mrf.mxu0 }
  0xfd   : > { %v699_v34 = vmax.f32 %v623_v29, 0.0  ;;  %v723_v38 = vpack.c.bf16 %v701_v30, %v700_v35  ;;  %v644_v42 = vadd.f32 %v1880_v32, %v2208_v31 }
  0xfe   : > { %v635_v36 = vpop.f32.mrf.mxu0 }
  0xff   : > { %v722_v37 = vpack.c.bf16 %v699_v34, %v698_v33  ;;  %v636_v40 = vadd.f32 %v2208_v31, %v635_v36  ;;  %v704_v49 = vmax.f32 %v644_v42, 0.0 }
 0x100   : > { %v1881_v39 = vpop.f32.mrf.mxu0 }
 0x101   : > { %v647_v41 = vadd.f32 %v1881_v39, %v2208_v31  ;;  %1914 = vmatprep.mubr.msk.bf16.mxu1 %vm769_vm1, %v722_v37  ;;  %v702_v47 = vmax.f32 %v636_v40, 0.0 }
 0x102   : > { %v638_v43 = vpop.f32.mrf.mxu0  ;;  %1915 = vmatmul.mubr.msk.bf16.gmra.mxu1 %vm769_vm1, %v723_v38 }
 0x103   : > { %v639_v44 = vadd.f32 %v2208_v31, %v638_v43  ;;  %v705_v45 = vmax.f32 %v647_v41, 0.0 }
 0x104   : > { %v1884_v46 = vpop.f32.mrf.mxu0 }
 0x105   : > { %v703_v48 = vmax.f32 %v639_v44, 0.0  ;;  %v725_v52 = vpack.c.bf16 %v705_v45, %v704_v49  ;;  %v660_v56 = vadd.f32 %v1884_v46, %v2208_v31 }
 0x106   : > { %v651_v50 = vpop.f32.mrf.mxu0 }
 0x107   : > { %v724_v51 = vpack.c.bf16 %v703_v48, %v702_v47  ;;  %v652_v54 = vadd.f32 %v2208_v31, %v651_v50  ;;  %v708_v63 = vmax.f32 %v660_v56, 0.0 }
 0x108   : > { %v1885_v53 = vpop.f32.mrf.mxu0 }
 0x109   : > { %v663_v55 = vadd.f32 %v1885_v53, %v2208_v31  ;;  %1918 = vmatprep.mubr.msk.bf16.mxu1 %vm769_vm1, %v724_v51  ;;  %v706_v61 = vmax.f32 %v652_v54, 0.0 }
 0x10a   : > { %v654_v57 = vpop.f32.mrf.mxu0  ;;  %1919 = vmatmul.mubr.msk.bf16.gmra.mxu1 %vm769_vm1, %v725_v52 }
 0x10b   : > { %v655_v58 = vadd.f32 %v2208_v31, %v654_v57  ;;  %v709_v59 = vmax.f32 %v663_v55, 0.0 }
 0x10c   : > { %v1888_v60 = vpop.f32.mrf.mxu0 }
 0x10d   : > { %v707_v62 = vmax.f32 %v655_v58, 0.0  ;;  %v727_v2 = vpack.c.bf16 %v709_v59, %v708_v63  ;;  %v676_v6 = vadd.f32 %v1888_v60, %v2208_v31 }
 0x10e   : > { %v667_v0 = vpop.f32.mrf.mxu0 }
 0x10f   : > { %v726_v1 = vpack.c.bf16 %v707_v62, %v706_v61  ;;  %v668_v4 = vadd.f32 %v2208_v31, %v667_v0  ;;  %v712_v12 = vmax.f32 %v676_v6, 0.0 }
 0x110   : > { %v1889_v3 = vpop.f32.mrf.mxu0 }
 0x111   : > { %v679_v5 = vadd.f32 %v1889_v3, %v2208_v31  ;;  %1922 = vmatprep.mubr.msk.bf16.mxu1 %vm769_vm1, %v726_v1  ;;  %v710_v10 = vmax.f32 %v668_v4, 0.0 }
 0x112   : > { %v670_v7 = vpop.f32.mrf.mxu0  ;;  %1923 = vmatmul.mubr.msk.bf16.gmra.mxu1 %vm769_vm1, %v727_v2 }
 0x113   : > { %v671_v8 = vadd.f32 %v2208_v31, %v670_v7  ;;  %v713_v9 = vmax.f32 %v679_v5, 0.0  ;;  %v2056_v31 = vld [vmem:[%s2480_s7 + $0x18] sm:$0xff]  }
 0x114   : > { %1978 = vmatprep.subr.bf16.mxu1 %v2056_v31 }
 0x115   : > { %v711_v11 = vmax.f32 %v671_v8, 0.0  ;;  %v729_v14 = vpack.c.bf16 %v713_v9, %v712_v12  ;;  %1979 = vmatpush3.bf16.msra.mxu1 %v2056_v31 }
 0x116   : > { %1980 = vmatprep.subr.bf16.mxu1 %v2057_v16 }
 0x117   : > { %v728_v13 = vpack.c.bf16 %v711_v11, %v710_v10 }
 0x119   : > { %1926 = vmatprep.mubr.msk.bf16.mxu1 %vm769_vm1, %v728_v13  ;;  %1981 = vmatpush3.bf16.msra.mxu1 %v2057_v16 }
 0x11a   : > { %1927 = vmatmul.mubr.msk.bf16.gmra.mxu1 %vm769_vm1, %v729_v14  ;;  %1982 = vmatprep.subr.bf16.mxu1 %v2058_v17 }
 0x11d   : > { %1983 = vmatpush3.bf16.msra.mxu1 %v2058_v17 }
 0x11e   : > { %1984 = vmatprep.subr.bf16.mxu1 %v2059_v18 }
 0x121   : > { %1985 = vmatpush3.bf16.msra.mxu1 %v2059_v18 }
 0x1a2   : > { %v1900_v19 = vpop.f32.mrf.mxu1 }
 0x1a3   : > { %v861_v25 = vadd.f32 %v1900_v19, %v2276_v21 }
 0x1a4   : > { %v852_v20 = vpop.f32.mrf.mxu1 }
 0x1a5   : > { %v853_v23 = vadd.f32 %v2276_v21, %v852_v20  ;;  %v981_v33 = vmax.f32 %v861_v25, 0.0 }
 0x1a6   : > { %v1901_v22 = vpop.f32.mrf.mxu1 }
 0x1a7   : > { %v864_v24 = vadd.f32 %v1901_v22, %v2276_v21  ;;  %v979_v30 = vmax.f32 %v853_v23, 0.0 }
 0x1a8   : > { %v855_v26 = vpop.f32.mrf.mxu1 }
 0x1a9   : > { %v856_v27 = vadd.f32 %v2276_v21, %v855_v26  ;;  %v982_v28 = vmax.f32 %v864_v24, 0.0 }
 0x1aa   : > { %v1904_v29 = vpop.f32.mrf.mxu1 }
 0x1ab   : > { %v980_v32 = vmax.f32 %v856_v27, 0.0  ;;  %v1012_v36 = vpack.c.bf16 %v982_v28, %v981_v33  ;;  %v877_v40 = vadd.f32 %v1904_v29, %v2276_v21 }
 0x1ac   : > { %v868_v34 = vpop.f32.mrf.mxu1 }
 0x1ad   : > { %v1011_v35 = vpack.c.bf16 %v980_v32, %v979_v30  ;;  %v869_v38 = vadd.f32 %v2276_v21, %v868_v34  ;;  %v985_v47 = vmax.f32 %v877_v40, 0.0 }
 0x1ae   : > { %v1905_v37 = vpop.f32.mrf.mxu1 }
 0x1af   : > { %v880_v39 = vadd.f32 %v1905_v37, %v2276_v21  ;;  %1946 = vmatprep.mubr.bf16.mxu0 %v1011_v35  ;;  %v983_v45 = vmax.f32 %v869_v38, 0.0 }
 0x1b0   : > { %v871_v41 = vpop.f32.mrf.mxu1  ;;  %1947 = vmatmul.mubr.bf16.vlgmr.msra.gmra.mxu0 %v1012_v36 }
 0x1b1   : > { %v872_v42 = vadd.f32 %v2276_v21, %v871_v41  ;;  %v986_v43 = vmax.f32 %v880_v39, 0.0 }
 0x1b2   : > { %v1908_v44 = vpop.f32.mrf.mxu1 }
 0x1b3   : > { %v984_v46 = vmax.f32 %v872_v42, 0.0  ;;  %v1014_v50 = vpack.c.bf16 %v986_v43, %v985_v47  ;;  %v893_v54 = vadd.f32 %v1908_v44, %v2276_v21 }
 0x1b4   : > { %v884_v48 = vpop.f32.mrf.mxu1 }
 0x1b5   : > { %v1013_v49 = vpack.c.bf16 %v984_v46, %v983_v45  ;;  %v885_v52 = vadd.f32 %v2276_v21, %v884_v48  ;;  %v989_v61 = vmax.f32 %v893_v54, 0.0 }
 0x1b6   : > { %v1909_v51 = vpop.f32.mrf.mxu1 }
 0x1b7   : > { %v896_v53 = vadd.f32 %v1909_v51, %v2276_v21  ;;  %1950 = vmatprep.mubr.bf16.mxu0 %v1013_v49  ;;  %v987_v59 = vmax.f32 %v885_v52, 0.0 }
 0x1b8   : > { %v887_v55 = vpop.f32.mrf.mxu1  ;;  %1951 = vmatmul.mubr.bf16.gmra.mxu0 %v1014_v50 }
 0x1b9   : > { %v888_v56 = vadd.f32 %v2276_v21, %v887_v55  ;;  %v990_v57 = vmax.f32 %v896_v53, 0.0 }
 0x1ba   : > { %v1912_v58 = vpop.f32.mrf.mxu1 }
 0x1bb   : > { %v988_v60 = vmax.f32 %v888_v56, 0.0  ;;  %v1016_v0 = vpack.c.bf16 %v990_v57, %v989_v61  ;;  %v909_v4 = vadd.f32 %v1912_v58, %v2276_v21 }
 0x1bc   : > { %v900_v62 = vpop.f32.mrf.mxu1 }
 0x1bd   : > { %v1015_v63 = vpack.c.bf16 %v988_v60, %v987_v59  ;;  %v901_v2 = vadd.f32 %v2276_v21, %v900_v62  ;;  %v993_v11 = vmax.f32 %v909_v4, 0.0 }
 0x1be   : > { %v1913_v1 = vpop.f32.mrf.mxu1 }
 0x1bf   : > { %v912_v3 = vadd.f32 %v1913_v1, %v2276_v21  ;;  %1954 = vmatprep.mubr.bf16.mxu0 %v1015_v63  ;;  %v991_v9 = vmax.f32 %v901_v2, 0.0 }
 0x1c0   : > { %v903_v5 = vpop.f32.mrf.mxu1  ;;  %1955 = vmatmul.mubr.bf16.gmra.mxu0 %v1016_v0 }
 0x1c1   : > { %v904_v6 = vadd.f32 %v2276_v21, %v903_v5  ;;  %v994_v7 = vmax.f32 %v912_v3, 0.0 }
 0x1c2   : > { %v1916_v8 = vpop.f32.mrf.mxu1 }
 0x1c3   : > { %v992_v10 = vmax.f32 %v904_v6, 0.0  ;;  %v1018_v14 = vpack.c.bf16 %v994_v7, %v993_v11  ;;  %v925_v17 = vadd.f32 %v1916_v8, %v2276_v21  ;;  %v2313_v8 = vld [vmem:[%s2479_s6] ss:$0 sm:$0xff] }
 0x1c4   : > { %v916_v12 = vpop.f32.mrf.mxu1 }
 0x1c5   : > { %v1017_v13 = vpack.c.bf16 %v992_v10, %v991_v9  ;;  %v917_v31 = vadd.f32 %v2276_v21, %v916_v12  ;;  %v997_v25 = vmax.f32 %v925_v17, 0.0 }
 0x1c6   : > { %v1917_v15 = vpop.f32.mrf.mxu1 }
 0x1c7   : > { %v928_v16 = vadd.f32 %v1917_v15, %v2276_v21  ;;  %1958 = vmatprep.mubr.bf16.mxu0 %v1017_v13  ;;  %v995_v23 = vmax.f32 %v917_v31, 0.0 }
 0x1c8   : > { %v919_v18 = vpop.f32.mrf.mxu1  ;;  %1959 = vmatmul.mubr.bf16.gmra.mxu0 %v1018_v14 }
 0x1c9   : > { %v920_v19 = vadd.f32 %v2276_v21, %v919_v18  ;;  %v998_v20 = vmax.f32 %v928_v16, 0.0 }
 0x1ca   : > { %v1920_v22 = vpop.f32.mrf.mxu1 }
 0x1cb   : > { %v996_v24 = vmax.f32 %v920_v19, 0.0  ;;  %v1020_v28 = vpack.c.bf16 %v998_v20, %v997_v25  ;;  %v941_v33 = vadd.f32 %v1920_v22, %v2276_v21 }
 0x1cc   : > { %v932_v26 = vpop.f32.mrf.mxu1 }
 0x1cd   : > { %v1019_v27 = vpack.c.bf16 %v996_v24, %v995_v23  ;;  %v933_v30 = vadd.f32 %v2276_v21, %v932_v26  ;;  %v1001_v40 = vmax.f32 %v941_v33, 0.0 }
 0x1ce   : > { %v1921_v29 = vpop.f32.mrf.mxu1 }
 0x1cf   : > { %v944_v32 = vadd.f32 %v1921_v29, %v2276_v21  ;;  %1962 = vmatprep.mubr.bf16.mxu0 %v1019_v27  ;;  %v999_v38 = vmax.f32 %v933_v30, 0.0 }
 0x1d0   : > { %v935_v34 = vpop.f32.mrf.mxu1  ;;  %1963 = vmatmul.mubr.bf16.gmra.mxu0 %v1020_v28 }
 0x1d1   : > { %v936_v35 = vadd.f32 %v2276_v21, %v935_v34  ;;  %v1002_v36 = vmax.f32 %v944_v32, 0.0 }
 0x1d2   : > { %v1924_v37 = vpop.f32.mrf.mxu1 }
 0x1d3   : > { %v1000_v39 = vmax.f32 %v936_v35, 0.0  ;;  %v1022_v43 = vpack.c.bf16 %v1002_v36, %v1001_v40  ;;  %v957_v47 = vadd.f32 %v1924_v37, %v2276_v21 }
 0x1d4   : > { %v948_v41 = vpop.f32.mrf.mxu1 }
 0x1d5   : > { %v1021_v42 = vpack.c.bf16 %v1000_v39, %v999_v38  ;;  %v949_v45 = vadd.f32 %v2276_v21, %v948_v41  ;;  %v1005_v54 = vmax.f32 %v957_v47, 0.0 }
 0x1d6   : > { %v1925_v44 = vpop.f32.mrf.mxu1 }
 0x1d7   : > { %v960_v46 = vadd.f32 %v1925_v44, %v2276_v21  ;;  %1966 = vmatprep.mubr.bf16.mxu0 %v1021_v42  ;;  %v1003_v52 = vmax.f32 %v949_v45, 0.0 }
 0x1d8   : > { %v951_v48 = vpop.f32.mrf.mxu1  ;;  %1967 = vmatmul.mubr.bf16.gmra.mxu0 %v1022_v43 }
 0x1d9   : > { %v952_v49 = vadd.f32 %v2276_v21, %v951_v48  ;;  %v1006_v50 = vmax.f32 %v960_v46, 0.0 }
 0x1da   : > { %v1928_v51 = vpop.f32.mrf.mxu1 }
 0x1db   : > { %v1004_v53 = vmax.f32 %v952_v49, 0.0  ;;  %v1024_v57 = vpack.c.bf16 %v1006_v50, %v1005_v54  ;;  %v973_v61 = vadd.f32 %v1928_v51, %v2276_v21 }
 0x1dc   : > { %v964_v55 = vpop.f32.mrf.mxu1 }
 0x1dd   : > { %v1023_v56 = vpack.c.bf16 %v1004_v53, %v1003_v52  ;;  %v965_v59 = vadd.f32 %v2276_v21, %v964_v55  ;;  %v1009_v3 = vmax.f32 %v973_v61, 0.0 }
 0x1de   : > { %v1929_v58 = vpop.f32.mrf.mxu1 }
 0x1df   : > { %v976_v60 = vadd.f32 %v1929_v58, %v2276_v21  ;;  %1970 = vmatprep.mubr.bf16.mxu0 %v1023_v56  ;;  %v1007_v1 = vmax.f32 %v965_v59, 0.0 }
 0x1e0   : > { %v967_v62 = vpop.f32.mrf.mxu1  ;;  %1971 = vmatmul.mubr.bf16.gmra.mxu0 %v1024_v57 }
 0x1e1   : > { %v968_v63 = vadd.f32 %v2276_v21, %v967_v62  ;;  %v1010_v0 = vmax.f32 %v976_v60, 0.0 }
 0x1e3   : > { %v1008_v2 = vmax.f32 %v968_v63, 0.0  ;;  %v1026_v5 = vpack.c.bf16 %v1010_v0, %v1009_v3 }
 0x1e5   : > { %v1025_v4 = vpack.c.bf16 %v1008_v2, %v1007_v1 }
 0x1e7   : > { %1974 = vmatprep.mubr.bf16.mxu0 %v1025_v4 }
 0x1e8   : > { %1975 = vmatmul.mubr.bf16.gmra.mxu0 %v1026_v5 }
 0x270   : > { %v1948_v6 = vpop.f32.mrf.mxu0 }
 0x271   : > { %v1141_v11 = vadd.f32 %v1948_v6, %v2313_v8 }
 0x272   : > { %v1132_v7 = vpop.f32.mrf.mxu0 }
 0x273   : > { %v1133_v10 = vadd.f32 %v2313_v8, %v1132_v7  ;;  %v1261_v17 = vmax.f32 %v1141_v11, 0.0 }
 0x274   : > { %v1949_v9 = vpop.f32.mrf.mxu0 }
 0x275   : > { %v1144_v21 = vadd.f32 %v1949_v9, %v2313_v8  ;;  %v1259_v31 = vmax.f32 %v1133_v10, 0.0 }
 0x276   : > { %v1135_v12 = vpop.f32.mrf.mxu0 }
 0x277   : > { %v1136_v13 = vadd.f32 %v2313_v8, %v1135_v12  ;;  %v1262_v14 = vmax.f32 %v1144_v21, 0.0 }
 0x278   : > { %v1952_v15 = vpop.f32.mrf.mxu0 }
 0x279   : > { %v1260_v16 = vmax.f32 %v1136_v13, 0.0  ;;  %v1292_v20 = vpack.c.bf16 %v1262_v14, %v1261_v17  ;;  %v1157_v25 = vadd.f32 %v1952_v15, %v2313_v8 }
 0x27a   : > { %v1148_v18 = vpop.f32.mrf.mxu0 }
 0x27b   : > { %v1291_v19 = vpack.c.bf16 %v1260_v16, %v1259_v31  ;;  %v1149_v23 = vadd.f32 %v2313_v8, %v1148_v18  ;;  %v1265_v33 = vmax.f32 %v1157_v25, 0.0 }
 0x27c   : > { %v1953_v22 = vpop.f32.mrf.mxu0 }
 0x27d   : > { %v1160_v24 = vadd.f32 %v1953_v22, %v2313_v8  ;;  %1986 = vmatprep.mubr.msk.bf16.mxu1 %vm769_vm1, %v1291_v19  ;;  %v1263_v30 = vmax.f32 %v1149_v23, 0.0 }
 0x27e   : > { %v1151_v26 = vpop.f32.mrf.mxu0  ;;  %1987 = vmatmul.mubr.msk.bf16.vlgmr.msra.gmra.mxu1 %vm769_vm1, %v1292_v20 }
 0x27f   : > { %v1152_v27 = vadd.f32 %v2313_v8, %v1151_v26  ;;  %v1266_v28 = vmax.f32 %v1160_v24, 0.0 }
 0x280   : > { %v1956_v29 = vpop.f32.mrf.mxu0 }
 0x281   : > { %v1264_v32 = vmax.f32 %v1152_v27, 0.0  ;;  %v1294_v36 = vpack.c.bf16 %v1266_v28, %v1265_v33  ;;  %v1173_v40 = vadd.f32 %v1956_v29, %v2313_v8 }
 0x282   : > { %v1164_v34 = vpop.f32.mrf.mxu0 }
 0x283   : > { %v1293_v35 = vpack.c.bf16 %v1264_v32, %v1263_v30  ;;  %v1165_v38 = vadd.f32 %v2313_v8, %v1164_v34  ;;  %v1269_v47 = vmax.f32 %v1173_v40, 0.0 }
 0x284   : > { %v1957_v37 = vpop.f32.mrf.mxu0 }
 0x285   : > { %v1176_v39 = vadd.f32 %v1957_v37, %v2313_v8  ;;  %1990 = vmatprep.mubr.msk.bf16.mxu1 %vm769_vm1, %v1293_v35  ;;  %v1267_v45 = vmax.f32 %v1165_v38, 0.0 }
 0x286   : > { %v1167_v41 = vpop.f32.mrf.mxu0  ;;  %1991 = vmatmul.mubr.msk.bf16.gmra.mxu1 %vm769_vm1, %v1294_v36 }
 0x287   : > { %v1168_v42 = vadd.f32 %v2313_v8, %v1167_v41  ;;  %v1270_v43 = vmax.f32 %v1176_v39, 0.0 }
 0x288   : > { %v1960_v44 = vpop.f32.mrf.mxu0 }
 0x289   : > { %v1268_v46 = vmax.f32 %v1168_v42, 0.0  ;;  %v1296_v50 = vpack.c.bf16 %v1270_v43, %v1269_v47  ;;  %v1189_v54 = vadd.f32 %v1960_v44, %v2313_v8 }
 0x28a   : > { %v1180_v48 = vpop.f32.mrf.mxu0 }
 0x28b   : > { %v1295_v49 = vpack.c.bf16 %v1268_v46, %v1267_v45  ;;  %v1181_v52 = vadd.f32 %v2313_v8, %v1180_v48  ;;  %v1273_v61 = vmax.f32 %v1189_v54, 0.0 }
 0x28c   : > { %v1961_v51 = vpop.f32.mrf.mxu0 }
 0x28d   : > { %v1192_v53 = vadd.f32 %v1961_v51, %v2313_v8  ;;  %1994 = vmatprep.mubr.msk.bf16.mxu1 %vm769_vm1, %v1295_v49  ;;  %v1271_v59 = vmax.f32 %v1181_v52, 0.0 }
 0x28e   : > { %v1183_v55 = vpop.f32.mrf.mxu0  ;;  %1995 = vmatmul.mubr.msk.bf16.gmra.mxu1 %vm769_vm1, %v1296_v50 }
 0x28f   : > { %v1184_v56 = vadd.f32 %v2313_v8, %v1183_v55  ;;  %v1274_v57 = vmax.f32 %v1192_v53, 0.0 }
 0x290   : > { %v1964_v58 = vpop.f32.mrf.mxu0 }
 0x291   : > { %v1272_v60 = vmax.f32 %v1184_v56, 0.0  ;;  %v1298_v0 = vpack.c.bf16 %v1274_v57, %v1273_v61  ;;  %v1205_v4 = vadd.f32 %v1964_v58, %v2313_v8  ;;  %v2366_v56 = vld [vmem:[%s2481_s8] ss:$0 sm:$0xff] }
 0x292   : > { %v1196_v62 = vpop.f32.mrf.mxu0 }
 0x293   : > { %v1297_v63 = vpack.c.bf16 %v1272_v60, %v1271_v59  ;;  %v1197_v2 = vadd.f32 %v2313_v8, %v1196_v62  ;;  %v1277_v11 = vmax.f32 %v1205_v4, 0.0 }
 0x294   : > { %v1965_v1 = vpop.f32.mrf.mxu0 }
 0x295   : > { %v1208_v3 = vadd.f32 %v1965_v1, %v2313_v8  ;;  %1998 = vmatprep.mubr.msk.bf16.mxu1 %vm769_vm1, %v1297_v63  ;;  %v1275_v10 = vmax.f32 %v1197_v2, 0.0 }
 0x296   : > { %v1199_v5 = vpop.f32.mrf.mxu0  ;;  %1999 = vmatmul.mubr.msk.bf16.gmra.mxu1 %vm769_vm1, %v1298_v0 }
 0x297   : > { %v1200_v6 = vadd.f32 %v2313_v8, %v1199_v5  ;;  %v1278_v7 = vmax.f32 %v1208_v3, 0.0 }
 0x298   : > { %v1968_v9 = vpop.f32.mrf.mxu0 }
 0x299   : > { %v1276_v21 = vmax.f32 %v1200_v6, 0.0  ;;  %v1300_v14 = vpack.c.bf16 %v1278_v7, %v1277_v11  ;;  %v1221_v17 = vadd.f32 %v1968_v9, %v2313_v8 }
 0x29a   : > { %v1212_v12 = vpop.f32.mrf.mxu0 }
 0x29b   : > { %v1299_v13 = vpack.c.bf16 %v1276_v21, %v1275_v10  ;;  %v1213_v31 = vadd.f32 %v2313_v8, %v1212_v12  ;;  %v1281_v25 = vmax.f32 %v1221_v17, 0.0 }
 0x29c   : > { %v1969_v15 = vpop.f32.mrf.mxu0 }
 0x29d   : > { %v1224_v16 = vadd.f32 %v1969_v15, %v2313_v8  ;;  %2002 = vmatprep.mubr.msk.bf16.mxu1 %vm769_vm1, %v1299_v13  ;;  %v1279_v23 = vmax.f32 %v1213_v31, 0.0 }
 0x29e   : > { %v1215_v18 = vpop.f32.mrf.mxu0  ;;  %2003 = vmatmul.mubr.msk.bf16.gmra.mxu1 %vm769_vm1, %v1300_v14 }
 0x29f   : > { %v1216_v19 = vadd.f32 %v2313_v8, %v1215_v18  ;;  %v1282_v20 = vmax.f32 %v1224_v16, 0.0 }
 0x2a0   : > { %v1972_v22 = vpop.f32.mrf.mxu0 }
 0x2a1   : > { %v1280_v24 = vmax.f32 %v1216_v19, 0.0  ;;  %v1302_v28 = vpack.c.bf16 %v1282_v20, %v1281_v25  ;;  %v1237_v33 = vadd.f32 %v1972_v22, %v2313_v8 }
 0x2a2   : > { %v1228_v26 = vpop.f32.mrf.mxu0 }
 0x2a3   : > { %v1301_v27 = vpack.c.bf16 %v1280_v24, %v1279_v23  ;;  %v1229_v30 = vadd.f32 %v2313_v8, %v1228_v26  ;;  %v1285_v40 = vmax.f32 %v1237_v33, 0.0 }
 0x2a4   : > { %v1973_v29 = vpop.f32.mrf.mxu0 }
 0x2a5   : > { %v1240_v32 = vadd.f32 %v1973_v29, %v2313_v8  ;;  %2006 = vmatprep.mubr.msk.bf16.mxu1 %vm769_vm1, %v1301_v27  ;;  %v1283_v38 = vmax.f32 %v1229_v30, 0.0 }
 0x2a6   : > { %v1231_v34 = vpop.f32.mrf.mxu0  ;;  %2007 = vmatmul.mubr.msk.bf16.gmra.mxu1 %vm769_vm1, %v1302_v28 }
 0x2a7   : > { %v1232_v35 = vadd.f32 %v2313_v8, %v1231_v34  ;;  %v1286_v36 = vmax.f32 %v1240_v32, 0.0 }
 0x2a8   : > { %v1976_v37 = vpop.f32.mrf.mxu0 }
 0x2a9   : > { %v1284_v39 = vmax.f32 %v1232_v35, 0.0  ;;  %v1304_v43 = vpack.c.bf16 %v1286_v36, %v1285_v40  ;;  %v1253_v47 = vadd.f32 %v1976_v37, %v2313_v8 }
 0x2aa   : > { %v1244_v41 = vpop.f32.mrf.mxu0 }
 0x2ab   : > { %v1303_v42 = vpack.c.bf16 %v1284_v39, %v1283_v38  ;;  %v1245_v45 = vadd.f32 %v2313_v8, %v1244_v41  ;;  %v1289_v53 = vmax.f32 %v1253_v47, 0.0 }
 0x2ac   : > { %v1977_v44 = vpop.f32.mrf.mxu0 }
 0x2ad   : > { %v1256_v46 = vadd.f32 %v1977_v44, %v2313_v8  ;;  %2010 = vmatprep.mubr.msk.bf16.mxu1 %vm769_vm1, %v1303_v42  ;;  %v1287_v51 = vmax.f32 %v1245_v45, 0.0 }
 0x2ae   : > { %v1247_v48 = vpop.f32.mrf.mxu0  ;;  %2011 = vmatmul.mubr.msk.bf16.gmra.mxu1 %vm769_vm1, %v1304_v43 }
 0x2af   : > { %v1248_v49 = vadd.f32 %v2313_v8, %v1247_v48  ;;  %v1290_v50 = vmax.f32 %v1256_v46, 0.0 }
 0x2b1   : > { %v1288_v52 = vmax.f32 %v1248_v49, 0.0  ;;  %v1306_v55 = vpack.c.bf16 %v1290_v50, %v1289_v53 }
 0x2b3   : > { %v1305_v54 = vpack.c.bf16 %v1288_v52, %v1287_v51 }
 0x2b5   : > { %2014 = vmatprep.mubr.msk.bf16.mxu1 %vm769_vm1, %v1305_v54 }
 0x2b6   : > { %2015 = vmatmul.mubr.msk.bf16.gmra.mxu1 %vm769_vm1, %v1306_v55 }
 0x33e   : > { %v1988_v57 = vpop.f32.mrf.mxu1 }
 0x33f   : > { %v1437_v58 = vadd.f32 %v1988_v57, %v2366_v56 }
 0x340   : > { %v1428_v8 = vpop.f32.mrf.mxu1 }
 0x341   : > { %v1557_v59 = vmax.f32 %v1437_v58, 0.0  ;;  %v1429_v60 = vadd.f32 %v2366_v56, %v1428_v8 }
 0x342   : > { %v1989_v61 = vpop.f32.mrf.mxu1 }
 0x343   : > { %1589 = vst.msk [vmem:[%s2373_s25 + $0x10] sm:$0xff] %vm472_vm0, %v1557_v59  ;;  %v1555_v62 = vmax.f32 %v1429_v60, 0.0  ;;  %v1440_v63 = vadd.f32 %v1989_v61, %v2366_v56 }
 0x344   : > { %v1431_v0 = vpop.f32.mrf.mxu1 }
 0x345   : > { %1587 = vst.msk [vmem:[%s2373_s25] sm:$0xff] %vm472_vm0, %v1555_v62  ;;  %v1558_v1 = vmax.f32 %v1440_v63, 0.0  ;;  %v1432_v2 = vadd.f32 %v2366_v56, %v1431_v0 }
 0x346   : > { %v1992_v3 = vpop.f32.mrf.mxu1 }
 0x347   : > { %1590 = vst.msk [vmem:[%s2373_s25 + $0x18] sm:$0xff] %vm472_vm0, %v1558_v1  ;;  %v1556_v4 = vmax.f32 %v1432_v2, 0.0  ;;  %v1453_v5 = vadd.f32 %v1992_v3, %v2366_v56 }
 0x348   : > { %v1444_v6 = vpop.f32.mrf.mxu1 }
 0x349   : > { %1588 = vst.msk [vmem:[%s2373_s25 + $0x8] sm:$0xff] %vm472_vm0, %v1556_v4  ;;  %v1561_v7 = vmax.f32 %v1453_v5, 0.0  ;;  %v1445_v9 = vadd.f32 %v2366_v56, %v1444_v6 }
 0x34a   : > { %v1993_v10 = vpop.f32.mrf.mxu1 }
 0x34b   : > { %1593 = vst.msk [vmem:[%s2373_s25 + $0x30] sm:$0xff] %vm472_vm0, %v1561_v7  ;;  %v1559_v21 = vmax.f32 %v1445_v9, 0.0  ;;  %v1456_v11 = vadd.f32 %v1993_v10, %v2366_v56 }
 0x34c   : > { %v1447_v12 = vpop.f32.mrf.mxu1 }
 0x34d   : > { %1591 = vst.msk [vmem:[%s2373_s25 + $0x20] sm:$0xff] %vm472_vm0, %v1559_v21  ;;  %v1562_v13 = vmax.f32 %v1456_v11, 0.0  ;;  %v1448_v14 = vadd.f32 %v2366_v56, %v1447_v12 }
 0x34e   : > { %v1996_v15 = vpop.f32.mrf.mxu1 }
 0x34f   : > { %1594 = vst.msk [vmem:[%s2373_s25 + $0x38] sm:$0xff] %vm472_vm0, %v1562_v13  ;;  %v1560_v31 = vmax.f32 %v1448_v14, 0.0  ;;  %v1469_v16 = vadd.f32 %v1996_v15, %v2366_v56 }
 0x350   : > { %v1460_v17 = vpop.f32.mrf.mxu1 }
 0x351   : > { %1592 = vst.msk [vmem:[%s2373_s25 + $0x28] sm:$0xff] %vm472_vm0, %v1560_v31  ;;  %v1565_v18 = vmax.f32 %v1469_v16, 0.0  ;;  %v1461_v19 = vadd.f32 %v2366_v56, %v1460_v17 }
 0x352   : > { %v1997_v20 = vpop.f32.mrf.mxu1 }
 0x353   : > { %1597 = vst.msk [vmem:[%s2373_s25 + $0x50] sm:$0xff] %vm472_vm0, %v1565_v18  ;;  %v1563_v22 = vmax.f32 %v1461_v19, 0.0  ;;  %v1472_v23 = vadd.f32 %v1997_v20, %v2366_v56 }
 0x354   : > { %v1463_v24 = vpop.f32.mrf.mxu1 }
 0x355   : > { %1595 = vst.msk [vmem:[%s2373_s25 + $0x40] sm:$0xff] %vm472_vm0, %v1563_v22  ;;  %v1566_v25 = vmax.f32 %v1472_v23, 0.0  ;;  %v1464_v26 = vadd.f32 %v2366_v56, %v1463_v24 }
 0x356   : > { %v2000_v27 = vpop.f32.mrf.mxu1 }
 0x357   : > { %1598 = vst.msk [vmem:[%s2373_s25 + $0x58] sm:$0xff] %vm472_vm0, %v1566_v25  ;;  %v1564_v28 = vmax.f32 %v1464_v26, 0.0  ;;  %v1485_v29 = vadd.f32 %v2000_v27, %v2366_v56 }
 0x358   : > { %v1476_v30 = vpop.f32.mrf.mxu1 }
 0x359   : > { %1596 = vst.msk [vmem:[%s2373_s25 + $0x48] sm:$0xff] %vm472_vm0, %v1564_v28  ;;  %v1569_v32 = vmax.f32 %v1485_v29, 0.0  ;;  %v1477_v33 = vadd.f32 %v2366_v56, %v1476_v30 }
 0x35a   : > { %v2001_v34 = vpop.f32.mrf.mxu1 }
 0x35b   : > { %1601 = vst.msk [vmem:[%s2373_s25 + $0x70] sm:$0xff] %vm472_vm0, %v1569_v32  ;;  %v1567_v35 = vmax.f32 %v1477_v33, 0.0  ;;  %v1488_v36 = vadd.f32 %v2001_v34, %v2366_v56 }
 0x35c   : > { %v1479_v37 = vpop.f32.mrf.mxu1 }
 0x35d   : > { %1599 = vst.msk [vmem:[%s2373_s25 + $0x60] sm:$0xff] %vm472_vm0, %v1567_v35  ;;  %v1570_v38 = vmax.f32 %v1488_v36, 0.0  ;;  %v1480_v39 = vadd.f32 %v2366_v56, %v1479_v37 }
 0x35e   : > { %v2004_v40 = vpop.f32.mrf.mxu1 }
 0x35f   : > { %1602 = vst.msk [vmem:[%s2373_s25 + $0x78] sm:$0xff] %vm472_vm0, %v1570_v38  ;;  %v1568_v41 = vmax.f32 %v1480_v39, 0.0  ;;  %v1501_v42 = vadd.f32 %v2004_v40, %v2366_v56 }
 0x360   : > { %v1492_v43 = vpop.f32.mrf.mxu1 }
 0x361   : > { %1600 = vst.msk [vmem:[%s2373_s25 + $0x68] sm:$0xff] %vm472_vm0, %v1568_v41  ;;  %v1573_v44 = vmax.f32 %v1501_v42, 0.0  ;;  %v1493_v45 = vadd.f32 %v2366_v56, %v1492_v43 }
 0x362   : > { %v2005_v46 = vpop.f32.mrf.mxu1 }
 0x363   : > { %1605 = vst.msk [vmem:[%s2373_s25 + $0x90] sm:$0xff] %vm472_vm0, %v1573_v44  ;;  %v1571_v47 = vmax.f32 %v1493_v45, 0.0  ;;  %v1504_v48 = vadd.f32 %v2005_v46, %v2366_v56 }
 0x364   : > { %v1495_v49 = vpop.f32.mrf.mxu1 }
 0x365   : > { %1603 = vst.msk [vmem:[%s2373_s25 + $0x80] sm:$0xff] %vm472_vm0, %v1571_v47  ;;  %v1574_v50 = vmax.f32 %v1504_v48, 0.0  ;;  %v1496_v51 = vadd.f32 %v2366_v56, %v1495_v49 }
 0x366   : > { %v2008_v52 = vpop.f32.mrf.mxu1 }
 0x367   : > { %1606 = vst.msk [vmem:[%s2373_s25 + $0x98] sm:$0xff] %vm472_vm0, %v1574_v50  ;;  %v1572_v53 = vmax.f32 %v1496_v51, 0.0  ;;  %v1517_v54 = vadd.f32 %v2008_v52, %v2366_v56 }
 0x368   : > { %v1508_v55 = vpop.f32.mrf.mxu1 }
 0x369   : > { %1604 = vst.msk [vmem:[%s2373_s25 + $0x88] sm:$0xff] %vm472_vm0, %v1572_v53  ;;  %v1577_v57 = vmax.f32 %v1517_v54, 0.0  ;;  %v1509_v58 = vadd.f32 %v2366_v56, %v1508_v55 }
 0x36a   : > { %v2009_v8 = vpop.f32.mrf.mxu1 }
 0x36b   : > { %1609 = vst.msk [vmem:[%s2373_s25 + $0xb0] sm:$0xff] %vm472_vm0, %v1577_v57  ;;  %v1575_v59 = vmax.f32 %v1509_v58, 0.0  ;;  %v1520_v60 = vadd.f32 %v2009_v8, %v2366_v56 }
 0x36c   : > { %v1511_v61 = vpop.f32.mrf.mxu1 }
 0x36d   : > { %1607 = vst.msk [vmem:[%s2373_s25 + $0xa0] sm:$0xff] %vm472_vm0, %v1575_v59  ;;  %v1578_v62 = vmax.f32 %v1520_v60, 0.0  ;;  %v1512_v63 = vadd.f32 %v2366_v56, %v1511_v61 }
 0x36e   : > { %v2012_v0 = vpop.f32.mrf.mxu1 }
 0x36f   : > { %1610 = vst.msk [vmem:[%s2373_s25 + $0xb8] sm:$0xff] %vm472_vm0, %v1578_v62  ;;  %v1576_v1 = vmax.f32 %v1512_v63, 0.0  ;;  %v1533_v2 = vadd.f32 %v2012_v0, %v2366_v56 }
 0x370   : > { %v1524_v3 = vpop.f32.mrf.mxu1 }
 0x371   : > { %1608 = vst.msk [vmem:[%s2373_s25 + $0xa8] sm:$0xff] %vm472_vm0, %v1576_v1  ;;  %v1581_v4 = vmax.f32 %v1533_v2, 0.0  ;;  %v1525_v5 = vadd.f32 %v2366_v56, %v1524_v3 }
 0x372   : > { %v2013_v6 = vpop.f32.mrf.mxu1 }
 0x373   : > { %1613 = vst.msk [vmem:[%s2373_s25 + $0xd0] sm:$0xff] %vm472_vm0, %v1581_v4  ;;  %v1579_v7 = vmax.f32 %v1525_v5, 0.0  ;;  %v1536_v9 = vadd.f32 %v2013_v6, %v2366_v56 }
 0x374   : > { %v1527_v10 = vpop.f32.mrf.mxu1 }
 0x375   : > { %1611 = vst.msk [vmem:[%s2373_s25 + $0xc0] sm:$0xff] %vm472_vm0, %v1579_v7  ;;  %v1582_v21 = vmax.f32 %v1536_v9, 0.0  ;;  %v1528_v11 = vadd.f32 %v2366_v56, %v1527_v10 }
 0x376   : > { %v2016_v12 = vpop.f32.mrf.mxu1 }
 0x377   : > { %1614 = vst.msk [vmem:[%s2373_s25 + $0xd8] sm:$0xff] %vm472_vm0, %v1582_v21  ;;  %v1580_v13 = vmax.f32 %v1528_v11, 0.0  ;;  %v1549_v14 = vadd.f32 %v2016_v12, %v2366_v56 }
 0x378   : > { %v1540_v15 = vpop.f32.mrf.mxu1 }
 0x379   : > { %1612 = vst.msk [vmem:[%s2373_s25 + $0xc8] sm:$0xff] %vm472_vm0, %v1580_v13  ;;  %v1585_v31 = vmax.f32 %v1549_v14, 0.0  ;;  %v1541_v16 = vadd.f32 %v2366_v56, %v1540_v15 }
 0x37a   : > { %v2017_v17 = vpop.f32.mrf.mxu1 }
 0x37b   : > { %1617 = vst.msk [vmem:[%s2373_s25 + $0xf0] sm:$0xff] %vm472_vm0, %v1585_v31  ;;  %v1583_v18 = vmax.f32 %v1541_v16, 0.0  ;;  %v1552_v19 = vadd.f32 %v2017_v17, %v2366_v56 }
 0x37c   : > { %v1543_v20 = vpop.f32.mrf.mxu1 }
 0x37d   : > { %1615 = vst.msk [vmem:[%s2373_s25 + $0xe0] sm:$0xff] %vm472_vm0, %v1583_v18  ;;  %v1586_v22 = vmax.f32 %v1552_v19, 0.0  ;;  %v1544_v23 = vadd.f32 %v2366_v56, %v1543_v20 }
 0x37f   : > { %1618 = vst.msk [vmem:[%s2373_s25 + $0xf8] sm:$0xff] %vm472_vm0, %v1586_v22  ;;  %v1584_v24 = vmax.f32 %v1544_v23, 0.0 }
 0x381   : > { %1616 = vst.msk [vmem:[%s2373_s25 + $0xe8] sm:$0xff] %vm472_vm0, %v1584_v24 }
 0x382 PF: > { %s19_s30 = sadd.s32 1, %s2066_s30  }
 0x383   : > { %p16_p4 = scmp.ge.s32.totalorder %s19_s30, 6  }
 0x385   :  { %18 = sbr.rel (!%p16_p4) target bundleno = 1 (0x1), region = 86 }

</bundles_post_ra>
